<compile_context>
chip_gen: v7x
topology: tpu7x:2x2x1
jax: 0.10.0
libtpu: 0.0.40
codegen_flags: <defaults>
</compile_context>

<pallas_src>
import functools

import jax
import jax.numpy as jnp
from jax.experimental import pallas as pl
from jax.experimental.pallas import tpu as pltpu


def _qnet_kernel(num_layers, *refs):
    # refs layout:
    #   x_ref (bf16),
    #   w_enc (bf16), b_enc (f32),
    #   (w_h (bf16), b_h (f32)) * num_layers,
    #   w_dec (bf16, N padded to 128), b_dec (f32, padded),
    #   o_ref (f32, N padded to 128)
    x_ref = refs[0]
    o_ref = refs[-1]
    w_enc, b_enc = refs[1], refs[2]
    idx = 3

    # Encoder: bf16 x bf16 -> f32 accumulate on the MXU; bias + ReLU in f32.
    h = jnp.dot(x_ref[...], w_enc[...], preferred_element_type=jnp.float32)
    h = jnp.maximum(h + b_enc[...], 0.0)

    for _ in range(num_layers):
        w_h, b_h = refs[idx], refs[idx + 1]
        idx += 2
        h = jnp.dot(h.astype(jnp.bfloat16), w_h[...],
                    preferred_element_type=jnp.float32)
        h = jnp.maximum(h + b_h[...], 0.0)

    w_dec, b_dec = refs[idx], refs[idx + 1]
    q = jnp.dot(h.astype(jnp.bfloat16), w_dec[...],
                preferred_element_type=jnp.float32) + b_dec[...]
    o_ref[...] = q.astype(o_ref.dtype)


def qnet_forward(x, params, *, num_layers, tile_b=None):
    """QNet forward pass as a single fused Pallas kernel tiled over batch.

    x:      [B, state_dim] float32
    params: dict (f32, weights stored as [in, out]):
            'w_enc' [S,H], 'b_enc' [1,H],
            'w_h' list of [H,H], 'b_h' list of [1,H],
            'w_dec' [H,A], 'b_dec' [1,A]
    """
    B, S = x.shape
    A = params["w_dec"].shape[1]

    # ---- batch tiling: whole batch in one step if small, else 512-row tiles.
    if tile_b is None:
        tile_b = B if B <= 512 else 512
    num_tiles = pl.cdiv(B, tile_b)
    B_pad = num_tiles * tile_b
    x_in = x.astype(jnp.bfloat16)
    if B_pad != B:
        x_in = jnp.pad(x_in, ((0, B_pad - B), (0, 0)))

    # ---- lane-dense output: pad action dim up to a multiple of 128.
    A_pad = max(128, pl.cdiv(A, 128) * 128)

    # ---- weights to bf16 (HBM + MXU inputs); biases stay f32 for the VPU.
    w_enc = params["w_enc"].astype(jnp.bfloat16)
    b_enc = params["b_enc"].astype(jnp.float32)
    w_dec = params["w_dec"].astype(jnp.bfloat16)
    b_dec = params["b_dec"].astype(jnp.float32)
    if A_pad != A:
        w_dec = jnp.pad(w_dec, ((0, 0), (0, A_pad - A)))
        b_dec = jnp.pad(b_dec, ((0, 0), (0, A_pad - A)))

    weight_args = [w_enc, b_enc]
    for l in range(num_layers):
        weight_args += [params["w_h"][l].astype(jnp.bfloat16),
                        params["b_h"][l].astype(jnp.float32)]
    weight_args += [w_dec, b_dec]

    def full_spec(arr):
        # Constant across the batch grid: same block index every step, so the
        # pipeline does not re-fetch these between consecutive iterations.
        return pl.BlockSpec(arr.shape, lambda i: (0, 0))

    in_specs = [pl.BlockSpec((tile_b, S), lambda i: (i, 0))]
    in_specs += [full_spec(a) for a in weight_args]

    kernel = functools.partial(_qnet_kernel, num_layers)

    # Only shard across TensorCores (v7x megacore) when there is real work
    # per core; tiny grids stay single-core for the latency-bound case.
    semantics = ("parallel",) if num_tiles >= 8 else ("arbitrary",)

    q_padded = pl.pallas_call(
        kernel,
        out_shape=jax.ShapeDtypeStruct((B_pad, A_pad), jnp.float32),
        grid_spec=pltpu.PrefetchScalarGridSpec(
            num_scalar_prefetch=0,
            grid=(num_tiles,),
            in_specs=in_specs,
            out_specs=pl.BlockSpec((tile_b, A_pad), lambda i: (i, 0)),
        ),
        compiler_params=pltpu.CompilerParams(
            dimension_semantics=semantics,
            vmem_limit_bytes=32 * 1024 * 1024,
        ),
    )(x_in, *weight_args)

    return q_padded[:B, :A]


def init_params(key, state_dim, num_actions, num_layers, hidden_dim):
    """Deterministic synthetic params (f32); weights stored as [in, out]."""
    keys = jax.random.split(key, 2 * (num_layers + 2))
    k = iter(keys)

    def lin(kw, kb, fan_in, fan_out):
        bound = 1.0 / jnp.sqrt(fan_in)
        w = jax.random.uniform(kw, (fan_in, fan_out), jnp.float32, -bound, bound)
        b = jax.random.uniform(kb, (1, fan_out), jnp.float32, -bound, bound)
        return w, b

    w_enc, b_enc = lin(next(k), next(k), state_dim, hidden_dim)
    w_h, b_h = [], []
    for _ in range(num_layers):
        w, b = lin(next(k), next(k), hidden_dim, hidden_dim)
        w_h.append(w)
        b_h.append(b)
    w_dec, b_dec = lin(next(k), next(k), hidden_dim, num_actions)
    return dict(w_enc=w_enc, b_enc=b_enc, w_h=w_h, b_h=b_h,
                w_dec=w_dec, b_dec=b_dec)


def qnet_reference(x, params, num_layers):
    """Pure-f32 reference matching the PyTorch module semantics."""
    h = jnp.maximum(x @ params["w_enc"] + params["b_enc"], 0.0)
    for l in range(num_layers):
        h = jnp.maximum(h @ params["w_h"][l] + params["b_h"][l], 0.0)
    return h @ params["w_dec"] + params["b_dec"]


if __name__ == "__main__":
    # TODO(synk): `scaler` is None in this config; arbitrary nn.Module scalers
    # have no generic Pallas equivalent and are skipped.
    state_dim = 16
    num_actions = 8
    hidden_dim = 128
    num_layers = 1
    batch = 16

    key = jax.random.PRNGKey(0)
    kx, kp = jax.random.split(key)
    x = jax.random.normal(kx, (batch, state_dim), jnp.float32)
    params = init_params(kp, state_dim, num_actions, num_layers, hidden_dim)

    fwd = jax.jit(functools.partial(qnet_forward, num_layers=num_layers))
    q = fwd(x, params)
    q = jax.block_until_ready(q)

    q_ref = qnet_reference(x, params, num_layers)
    assert q.shape == (batch, num_actions)
    # bf16 matmul inputs with f32 accumulation => small deviation vs f32 ref.
    assert jnp.allclose(q, q_ref, atol=5e-2, rtol=5e-2), "mismatch vs reference"

    print("KERNEL_OK")
</pallas_src>

<mosaic_0001>
module attributes {stable_mosaic.version = 11 : i64} {
  func.func @_qnet_kernel(%arg0: i32, %arg1: memref<16x16xbf16, #tpu.memory_space<vmem>>, %arg2: memref<16x128xbf16, #tpu.memory_space<vmem>>, %arg3: memref<1x128xf32, #tpu.memory_space<vmem>>, %arg4: memref<128x128xbf16, #tpu.memory_space<vmem>>, %arg5: memref<1x128xf32, #tpu.memory_space<vmem>>, %arg6: memref<128x128xbf16, #tpu.memory_space<vmem>>, %arg7: memref<1x128xf32, #tpu.memory_space<vmem>>, %arg8: memref<16x128xf32, #tpu.memory_space<vmem>>) attributes {dimension_semantics = [#tpu.dimension_semantics<arbitrary>], iteration_bounds = array<i64: 1>, scalar_prefetch = 0 : i64, scratch_operands = 0 : i64, tpu.core_type = #tpu.core_type<tc>, window_params = [{transform_indices = @transform_0, window_bounds = array<i64: 16, 16>}, {pipeline_mode = #tpu.pipeline_mode<synchronous>, transform_indices = @transform_1, window_bounds = array<i64: 16, 128>}, {pipeline_mode = #tpu.pipeline_mode<synchronous>, transform_indices = @transform_2, window_bounds = array<i64: 1, 128>}, {pipeline_mode = #tpu.pipeline_mode<synchronous>, transform_indices = @transform_3, window_bounds = array<i64: 128, 128>}, {pipeline_mode = #tpu.pipeline_mode<synchronous>, transform_indices = @transform_4, window_bounds = array<i64: 1, 128>}, {pipeline_mode = #tpu.pipeline_mode<synchronous>, transform_indices = @transform_5, window_bounds = array<i64: 128, 128>}, {pipeline_mode = #tpu.pipeline_mode<synchronous>, transform_indices = @transform_6, window_bounds = array<i64: 1, 128>}, {transform_indices = @transform_7, window_bounds = array<i64: 16, 128>}]} {
    %c0 = arith.constant 0 : index
    %c0_0 = arith.constant 0 : index
    %0 = vector.load %arg1[%c0, %c0_0] : memref<16x16xbf16, #tpu.memory_space<vmem>>, vector<16x16xbf16>
    %c0_1 = arith.constant 0 : index
    %c0_2 = arith.constant 0 : index
    %1 = vector.load %arg2[%c0_1, %c0_2] : memref<16x128xbf16, #tpu.memory_space<vmem>>, vector<16x128xbf16>
    %cst = arith.constant dense<0.000000e+00> : vector<16x128xf32>
    %2 = tpu.matmul %0, %1, %cst {dimension_numbers = #tpu.dot_dimension_numbers<[1], [0], [0], [1], [0, 0, 1, 1], [], []>} : vector<16x16xbf16>, vector<16x128xbf16>, vector<16x128xf32> -> vector<16x128xf32>
    %c0_3 = arith.constant 0 : index
    %c0_4 = arith.constant 0 : index
    %3 = vector.load %arg3[%c0_3, %c0_4] : memref<1x128xf32, #tpu.memory_space<vmem>>, vector<1x128xf32>
    %4 = vector.broadcast %3 : vector<1x128xf32> to vector<16x128xf32>
    %5 = arith.addf %2, %4 : vector<16x128xf32>
    %cst_5 = arith.constant 0.000000e+00 : f32
    %6 = vector.broadcast %cst_5 : f32 to vector<16x128xf32>
    %7 = arith.maximumf %5, %6 : vector<16x128xf32>
    %8 = arith.truncf %7 : vector<16x128xf32> to vector<16x128xbf16>
    %c0_6 = arith.constant 0 : index
    %c0_7 = arith.constant 0 : index
    %9 = vector.load %arg4[%c0_6, %c0_7] : memref<128x128xbf16, #tpu.memory_space<vmem>>, vector<128x128xbf16>
    %cst_8 = arith.constant dense<0.000000e+00> : vector<16x128xf32>
    %10 = tpu.matmul %8, %9, %cst_8 {dimension_numbers = #tpu.dot_dimension_numbers<[1], [0], [0], [1], [0, 0, 1, 1], [], []>} : vector<16x128xbf16>, vector<128x128xbf16>, vector<16x128xf32> -> vector<16x128xf32>
    %c0_9 = arith.constant 0 : index
    %c0_10 = arith.constant 0 : index
    %11 = vector.load %arg5[%c0_9, %c0_10] : memref<1x128xf32, #tpu.memory_space<vmem>>, vector<1x128xf32>
    %12 = vector.broadcast %11 : vector<1x128xf32> to vector<16x128xf32>
    %13 = arith.addf %10, %12 : vector<16x128xf32>
    %cst_11 = arith.constant 0.000000e+00 : f32
    %14 = vector.broadcast %cst_11 : f32 to vector<16x128xf32>
    %15 = arith.maximumf %13, %14 : vector<16x128xf32>
    %16 = arith.truncf %15 : vector<16x128xf32> to vector<16x128xbf16>
    %c0_12 = arith.constant 0 : index
    %c0_13 = arith.constant 0 : index
    %17 = vector.load %arg6[%c0_12, %c0_13] : memref<128x128xbf16, #tpu.memory_space<vmem>>, vector<128x128xbf16>
    %cst_14 = arith.constant dense<0.000000e+00> : vector<16x128xf32>
    %18 = tpu.matmul %16, %17, %cst_14 {dimension_numbers = #tpu.dot_dimension_numbers<[1], [0], [0], [1], [0, 0, 1, 1], [], []>} : vector<16x128xbf16>, vector<128x128xbf16>, vector<16x128xf32> -> vector<16x128xf32>
    %c0_15 = arith.constant 0 : index
    %c0_16 = arith.constant 0 : index
    %19 = vector.load %arg7[%c0_15, %c0_16] : memref<1x128xf32, #tpu.memory_space<vmem>>, vector<1x128xf32>
    %20 = vector.broadcast %19 : vector<1x128xf32> to vector<16x128xf32>
    %21 = arith.addf %18, %20 : vector<16x128xf32>
    %c0_17 = arith.constant 0 : index
    %c0_18 = arith.constant 0 : index
    %22 = vector.load %arg8[%c0_17, %c0_18] : memref<16x128xf32, #tpu.memory_space<vmem>>, vector<16x128xf32>
    tpu.vector_store %arg8[%c0_17, %c0_18], %21 {strides = array<i32>} : memref<16x128xf32, #tpu.memory_space<vmem>>, vector<16x128xf32>,
    return
  }
  func.func @transform_0(%arg0: i32) -> (i32, i32) {
    %c0_i32 = arith.constant 0 : i32
    %c0_i32_0 = arith.constant 0 : i32
    return %arg0, %c0_i32 : i32, i32
  }
  func.func @transform_1(%arg0: i32) -> (i32, i32) {
    %c0_i32 = arith.constant 0 : i32
    %c0_i32_0 = arith.constant 0 : i32
    %c0_i32_1 = arith.constant 0 : i32
    return %c0_i32, %c0_i32_0 : i32, i32
  }
  func.func @transform_2(%arg0: i32) -> (i32, i32) {
    %c0_i32 = arith.constant 0 : i32
    %c0_i32_0 = arith.constant 0 : i32
    %c0_i32_1 = arith.constant 0 : i32
    return %c0_i32, %c0_i32_0 : i32, i32
  }
  func.func @transform_3(%arg0: i32) -> (i32, i32) {
    %c0_i32 = arith.constant 0 : i32
    %c0_i32_0 = arith.constant 0 : i32
    %c0_i32_1 = arith.constant 0 : i32
    return %c0_i32, %c0_i32_0 : i32, i32
  }
  func.func @transform_4(%arg0: i32) -> (i32, i32) {
    %c0_i32 = arith.constant 0 : i32
    %c0_i32_0 = arith.constant 0 : i32
    %c0_i32_1 = arith.constant 0 : i32
    return %c0_i32, %c0_i32_0 : i32, i32
  }
  func.func @transform_5(%arg0: i32) -> (i32, i32) {
    %c0_i32 = arith.constant 0 : i32
    %c0_i32_0 = arith.constant 0 : i32
    %c0_i32_1 = arith.constant 0 : i32
    return %c0_i32, %c0_i32_0 : i32, i32
  }
  func.func @transform_6(%arg0: i32) -> (i32, i32) {
    %c0_i32 = arith.constant 0 : i32
    %c0_i32_0 = arith.constant 0 : i32
    %c0_i32_1 = arith.constant 0 : i32
    return %c0_i32, %c0_i32_0 : i32, i32
  }
  func.func @transform_7(%arg0: i32) -> (i32, i32) {
    %c0_i32 = arith.constant 0 : i32
    %c0_i32_0 = arith.constant 0 : i32
    return %arg0, %c0_i32 : i32, i32
  }
}

</mosaic_0001>

<bundles_post_ra>
// kernel: qnet_forward.1
= control target key start
LH: loop header
LB: loop body
LE: loop exit
PB: predicated region body
PF: predicated region fallthrough
CT: control target
= control target key end

     0   :  { %v438_v0 = vmov 0.0   ;;  %vm439_vm0 = vmmov 0   ;;  %vm49_vm1 = vcmask 130048   ;;  %s569_s1 = inlined_call_operand.vmem [shape: bf16[16,128], index: 1, kind: input, shape index: {}]   ;;  %s570_s0 = inlined_call_operand.vmem [shape: bf16[16,16], index: 0, kind: input, shape index: {}]   ;;  %s571_s3 = inlined_call_operand.vmem [shape: bf16[128,128], index: 3, kind: input, shape index: {}]   ;;  %s572_s5 = inlined_call_operand.vmem [shape: bf16[128,128], index: 5, kind: input, shape index: {}]   ;;  %s573_s2 = inlined_call_operand.vmem [shape: f32[1,128], index: 2, kind: input, shape index: {}]   ;;  %s574_s4 = inlined_call_operand.vmem [shape: f32[1,128], index: 4, kind: input, shape index: {}]   ;;  %s575_s6 = inlined_call_operand.vmem [shape: f32[1,128], index: 6, kind: input, shape index: {}]   ;;  %s576_s7 = inlined_call_operand.vmem [shape: f32[16,128], index: 7, kind: output, shape index: {}]  }
   0x1   :  { %372 = vmatprep.subr.bf16.mxu0 %v438_v0  ;;  %v420_v1 = vld [vmem:[%s569_s1] sm:$0xff]   ;;  %374 = vmatprep.mubr.msk.bf16.mxu0 %vm439_vm0, %v438_v0  ;;  %v423_v4 = vld [vmem:[%s571_s3 + $0x8] sm:$0xff]   ;;  %v424_v5 = vld [vmem:[%s571_s3 + $0x10] sm:$0xff]  }
   0x2   :  { %v421_v2 = vld [vmem:[%s570_s0] sm:$0xff]   ;;  %378 = vmatprep.subr.bf16.mxu1 %v438_v0  ;;  %394 = vmatprep.mubr.msk.bf16.mxu1 %vm439_vm0, %v438_v0  ;;  %v425_v6 = vld [vmem:[%s571_s3 + $0x18] sm:$0xff]   ;;  %v427_v8 = vld [vmem:[%s571_s3 + $0x28] sm:$0xff]  }
   0x3   :  { %373 = vmatpush3.bf16.msra.mxu0 %v420_v1  ;;  %v422_v3 = vld [vmem:[%s571_s3] sm:$0xff]   ;;  %v428_v9 = vld [vmem:[%s571_s3 + $0x30] sm:$0xff]   ;;  %v429_v10 = vld [vmem:[%s571_s3 + $0x38] sm:$0xff]  }
   0x4   :  { %398 = vmatprep.subr.bf16.mxu0 %v438_v0  ;;  %379 = vmatpush3.bf16.msra.mxu1 %v422_v3  ;;  %v426_v7 = vld [vmem:[%s571_s3 + $0x20] sm:$0xff]   ;;  %v431_v12 = vld [vmem:[%s572_s5 + $0x8] sm:$0xff]   ;;  %v432_v13 = vld [vmem:[%s572_s5 + $0x10] sm:$0xff]  }
   0x5   :  { %380 = vmatprep.subr.bf16.mxu1 %v438_v0  ;;  %v430_v11 = vld [vmem:[%s572_s5] sm:$0xff]   ;;  %v433_v14 = vld [vmem:[%s572_s5 + $0x18] sm:$0xff]   ;;  %v435_v16 = vld [vmem:[%s572_s5 + $0x28] sm:$0xff]  }
   0x6   :  { %375 = vmatmul.mubr.msk.bf16.vlgmr.msra.gmra.mrb[0].mxu0 %vm49_vm1, %v421_v2  ;;  %v434_v15 = vld [vmem:[%s572_s5 + $0x20] sm:$0xff]   ;;  %v436_v27 = vld [vmem:[%s572_s5 + $0x30] sm:$0xff]   ;;  %v437_v28 = vld [vmem:[%s572_s5 + $0x38] sm:$0xff]  }
   0x7   :  { %414 = vmatprep.mubr.msk.bf16.mxu0 %vm439_vm0, %v438_v0  ;;  %399 = vmatpush3.bf16.msra.mxu0 %v430_v11  ;;  %v330_v17 = vld [vmem:[%s573_s2] ss:$0 sm:$0xff] }
   0x8   :  { %381 = vmatpush3.bf16.msra.mxu1 %v423_v4  ;;  %400 = vmatprep.subr.bf16.mxu0 %v438_v0  ;;  %v334_v29 = vld [vmem:[%s574_s4] ss:$0 sm:$0xff] }
   0x9   :  { %382 = vmatprep.subr.bf16.mxu1 %v438_v0  ;;  %v343_v39 = vld [vmem:[%s575_s6] ss:$0 sm:$0xff] }
   0xb   :  { %401 = vmatpush3.bf16.msra.mxu0 %v431_v12 }
   0xc   :  { %383 = vmatpush3.bf16.msra.mxu1 %v424_v5  ;;  %402 = vmatprep.subr.bf16.mxu0 %v438_v0 }
   0xd   :  { %384 = vmatprep.subr.bf16.mxu1 %v438_v0 }
   0xf   :  { %403 = vmatpush3.bf16.msra.mxu0 %v432_v13 }
  0x10   :  { %385 = vmatpush3.bf16.msra.mxu1 %v425_v6  ;;  %404 = vmatprep.subr.bf16.mxu0 %v438_v0 }
  0x11   :  { %386 = vmatprep.subr.bf16.mxu1 %v438_v0 }
  0x13   :  { %405 = vmatpush3.bf16.msra.mxu0 %v433_v14 }
  0x14   :  { %387 = vmatpush3.bf16.msra.mxu1 %v426_v7  ;;  %406 = vmatprep.subr.bf16.mxu0 %v438_v0 }
  0x15   :  { %388 = vmatprep.subr.bf16.mxu1 %v438_v0 }
  0x17   :  { %407 = vmatpush3.bf16.msra.mxu0 %v434_v15 }
  0x18   :  { %389 = vmatpush3.bf16.msra.mxu1 %v427_v8  ;;  %408 = vmatprep.subr.bf16.mxu0 %v438_v0 }
  0x19   :  { %390 = vmatprep.subr.bf16.mxu1 %v438_v0 }
  0x1b   :  { %409 = vmatpush3.bf16.msra.mxu0 %v435_v16 }
  0x1c   :  { %391 = vmatpush3.bf16.msra.mxu1 %v428_v9  ;;  %410 = vmatprep.subr.bf16.mxu0 %v438_v0 }
  0x1d   :  { %392 = vmatprep.subr.bf16.mxu1 %v438_v0 }
  0x1f   :  { %411 = vmatpush3.bf16.msra.mxu0 %v436_v27 }
  0x20   :  { %393 = vmatpush3.bf16.msra.mxu1 %v429_v10  ;;  %412 = vmatprep.subr.bf16.mxu0 %v438_v0 }
  0x23   :  { %413 = vmatpush3.bf16.msra.mxu0 %v437_v28 }
  0xd9   :  { %v87_v18 = vpop.f32.mrb[0].mxu0 }
  0xda   :  { %v88_v19 = vadd.f32 %v330_v17, %v87_v18  ;;  %v376_v20 = vpop.f32.mrb[1].mxu0 }
  0xdb   :  { %v90_v21 = vpop.f32.mrb[2].mxu0 }
  0xdc   :  { %v91_v22 = vadd.f32 %v330_v17, %v90_v21  ;;  %v377_v23 = vpop.f32.mrb[3].mxu0  ;;  %v94_v24 = vmax.f32 %v88_v19, 0.0 }
  0xde   :  { %v95_v25 = vmax.f32 %v91_v22, 0.0 }
  0xe0   :  { %v96_v26 = vpack.c.bf16 %v95_v25, %v94_v24 }
  0xe2   :  { %395 = vmatmul.mubr.bf16.vlgmr.msra.gmra.mrb[0].mxu1 %v96_v26 }
 0x1b5   :  { %v202_v30 = vpop.f32.mrb[0].mxu1 }
 0x1b6   :  { %v203_v31 = vadd.f32 %v334_v29, %v202_v30  ;;  %v396_v32 = vpop.f32.mrb[1].mxu1 }
 0x1b7   :  { %v205_v33 = vpop.f32.mrb[2].mxu1 }
 0x1b8   :  { %v206_v34 = vadd.f32 %v334_v29, %v205_v33  ;;  %v397_v35 = vpop.f32.mrb[3].mxu1  ;;  %v209_v36 = vmax.f32 %v203_v31, 0.0 }
 0x1ba   :  { %v210_v37 = vmax.f32 %v206_v34, 0.0 }
 0x1bc   :  { %v211_v38 = vpack.c.bf16 %v210_v37, %v209_v36 }
 0x1be   :  { %415 = vmatmul.mubr.bf16.vlgmr.msra.gmra.mrb[4].mxu0 %v211_v38 }
 0x291   :  { %v317_v40 = vpop.f32.mrb[4].mxu0 }
 0x292   :  { %v318_v41 = vadd.f32 %v343_v39, %v317_v40  ;;  %v416_v42 = vpop.f32.mrb[5].mxu0 }
 0x293   :  { %v320_v43 = vpop.f32.mrb[6].mxu0 }
 0x294   :  { %324 = vst [vmem:[%s576_s7] sm:$0xff] %v318_v41  ;;  %v321_v44 = vadd.f32 %v343_v39, %v320_v43  ;;  %v417_v45 = vpop.f32.mrb[7].mxu0 }
 0x296   :  { %325 = vst [vmem:[%s576_s7 + $0x8] sm:$0xff] %v321_v44 }

</bundles_post_ra>
